<compile_context>
chip_gen: v6e
topology: v6e:2x2x1
jax: 0.10.0
libtpu: 0.0.40
codegen_flags: <defaults>
</compile_context>

<pallas_src>
import functools

import jax
import jax.numpy as jnp
from jax.experimental import pallas as pl
from jax.experimental.pallas import tpu as pltpu


def _round_up(a, b):
    return (a + b - 1) // b * b


# ----------------------------------------------------------------------------
# Fused kernel: conv1 (VPU) -> conv2/conv3 (MXU, bf16) -> masked partial sums
#   x_ref  : (1, Cin, tm) f32      im_ref : (1, 1, tm) bf16  (im = 1 - mask)
#   w1/b1  : (C1, Cin)/(C1,1) f32  w2,w3  : bf16             b2,b3 : f32
#   o_ref  : (1, 1, C3, 128)       acc_ref: (C3, 128) f32 VMEM accumulator
# ----------------------------------------------------------------------------
def colornet_kernel(x_ref, im_ref, w1_ref, b1_ref, w2_ref, b2_ref,
                    w3_ref, b3_ref, o_ref, acc_ref, *, hw, ragged, inv_hw):
    t = pl.program_id(2)

    @pl.when(t == 0)
    def _init():
        acc_ref[...] = jnp.zeros_like(acc_ref)

    cin, tm = x_ref.shape[1], x_ref.shape[2]
    x = x_ref[0].astype(jnp.float32)               # (Cin, tm)
    im = im_ref[0].astype(jnp.float32)             # (1, tm)
    w1 = w1_ref[...]                               # (C1, Cin) f32

    # conv1: K == Cin is tiny -> VPU broadcast FMAs (skip an underfilled MXU pass)
    h = w1[:, 0:1] * x[0:1, :]
    for c in range(1, cin):
        h = h + w1[:, c:c + 1] * x[c:c + 1, :]
    h = jnp.maximum(h + b1_ref[...], 0.0)          # (C1, tm) f32

    # conv2 / conv3 on the MXU: bf16 operands, f32 accumulation
    h = jnp.dot(w2_ref[...], h.astype(jnp.bfloat16),
                preferred_element_type=jnp.float32) + b2_ref[...]
    h = jnp.maximum(h, 0.0)                        # (C2, tm) f32
    h = jnp.dot(w3_ref[...], h.astype(jnp.bfloat16),
                preferred_element_type=jnp.float32) + b3_ref[...]
    h = jnp.maximum(h, 0.0)                        # (C3, tm) f32

    prod = h * im                                  # masked activations

    if ragged:
        # last tile overhangs HW: out-of-bounds lanes carry garbage -> mask them
        num_t = pl.num_programs(2)
        tile = pl.program_id(1) * num_t + t
        lane = jax.lax.broadcasted_iota(jnp.int32, (1, tm), 1)
        prod = jnp.where(tile * tm + lane < hw, prod, 0.0)

    # lane-preserving (VPU-only) partial sums; no per-tile XLU reduce
    part = prod[:, 0:128]
    for s in range(1, tm // 128):
        part = part + prod[:, s * 128:(s + 1) * 128]
    acc_ref[...] += part

    @pl.when(t == pl.num_programs(2) - 1)
    def _finalize():
        o_ref[0, 0] = acc_ref[...] * inv_hw        # lane-dense (C3, 128) store


def colornet_forward(x, mask, params, tm=2048, spatial_chunks=None):
    B, Cin, H, W = x.shape
    HW = H * W
    C1 = params["w1"].shape[0]
    C2 = params["w2"].shape[0]
    C3 = params["w3"].shape[0]

    # ---- mask path (tiny tensor -> JAX wrapper) -----------------------------
    # F.interpolate(..., mode='nearest'): src = floor(dst * in / out)
    Hm, Wm = mask.shape[2], mask.shape[3]
    idx_h = (jnp.arange(H) * Hm) // H
    idx_w = (jnp.arange(W) * Wm) // W
    m_up = mask[:, :, idx_h][:, :, :, idx_w]                          # (B,1,H,W)
    im = jnp.where(m_up >= 1.0, 0.0, 1.0).astype(jnp.bfloat16).reshape(B, 1, HW)

    # ---- tiling --------------------------------------------------------------
    tm = max(128, min(_round_up(tm, 128), _round_up(HW, 128)))
    tiles = -(-HW // tm)
    if spatial_chunks is None:
        # v7x has 2 TensorCores: when batch alone can't fill them, also shard HW
        spatial_chunks = 2 if (B == 1 and tiles % 2 == 0) else 1
    NC = spatial_chunks if (spatial_chunks > 1 and tiles % spatial_chunks == 0) else 1
    T = tiles // NC
    ragged = (tiles * tm != HW)

    # ---- operands (no full-array pad/copy of x) ------------------------------
    x3 = x.reshape(B, Cin, HW)                                        # free reshape
    w1 = params["w1"].astype(jnp.float32)
    b1 = params["b1"].reshape(C1, 1).astype(jnp.float32)
    w2 = params["w2"].astype(jnp.bfloat16)
    b2 = params["b2"].reshape(C2, 1).astype(jnp.float32)
    w3 = params["w3"].astype(jnp.bfloat16)
    b3 = params["b3"].reshape(C3, 1).astype(jnp.float32)

    kernel = functools.partial(colornet_kernel, hw=HW, ragged=ragged,
                               inv_hw=float(1.0 / HW))

    out = pl.pallas_call(
        kernel,
        out_shape=jax.ShapeDtypeStruct((B, NC, C3, 128), jnp.float32),
        grid_spec=pltpu.PrefetchScalarGridSpec(
            num_scalar_prefetch=0,
            grid=(B, NC, T),
            in_specs=[
                pl.BlockSpec((1, Cin, tm), lambda b, c, t, T=T: (b, 0, c * T + t)),
                pl.BlockSpec((1, 1, tm),   lambda b, c, t, T=T: (b, 0, c * T + t)),
                pl.BlockSpec((C1, Cin), lambda b, c, t: (0, 0)),
                pl.BlockSpec((C1, 1),   lambda b, c, t: (0, 0)),
                pl.BlockSpec((C2, C1),  lambda b, c, t: (0, 0)),
                pl.BlockSpec((C2, 1),   lambda b, c, t: (0, 0)),
                pl.BlockSpec((C3, C2),  lambda b, c, t: (0, 0)),
                pl.BlockSpec((C3, 1),   lambda b, c, t: (0, 0)),
            ],
            out_specs=pl.BlockSpec((1, 1, C3, 128), lambda b, c, t: (b, c, 0, 0)),
            scratch_shapes=[pltpu.VMEM((C3, 128), jnp.float32)],
        ),
        compiler_params=pltpu.CompilerParams(
            dimension_semantics=("parallel", "parallel", "arbitrary")),
    )(x3, im, w1, b1, w2, b2, w3, b3)

    # combine spatial chunks + fold the 128 accumulator lanes (tiny tensor)
    pooled = jnp.sum(out, axis=(1, 3))                                # (B, C3)
    return pooled.reshape(B, C3, 1, 1)                                # AdaptiveAvgPool2d((1,1))


# ----------------------------------------------------------------------------
# Pure-JAX f32 reference (PyTorch semantics) for validation
# ----------------------------------------------------------------------------
def reference(x, mask, params):
    def conv1x1(w, b, h):
        return jnp.einsum("oc,bchw->bohw", w, h) + b.reshape(1, -1, 1, 1)

    h = jnp.maximum(conv1x1(params["w1"], params["b1"], x), 0.0)
    h = jnp.maximum(conv1x1(params["w2"], params["b2"], h), 0.0)
    h = jnp.maximum(conv1x1(params["w3"], params["b3"], h), 0.0)

    H, W = x.shape[2], x.shape[3]
    Hm, Wm = mask.shape[2], mask.shape[3]
    idx_h = (jnp.arange(H) * Hm) // H
    idx_w = (jnp.arange(W) * Wm) // W
    m = mask[:, :, idx_h][:, :, :, idx_w]
    m = jnp.where(m >= 1.0, 1.0, 0.0)
    light = h * (1.0 - m)
    return jnp.mean(light, axis=(2, 3), keepdims=True)                # (B,Cout,1,1)


if __name__ == "__main__":
    B, Cin, H, W = 2, 2, 16, 16      # in_channel = 2
    Cout = 128                       # out_channel = 128

    key = jax.random.PRNGKey(0)
    keys = jax.random.split(key, 10)

    x = jax.random.normal(keys[0], (B, Cin, H, W), dtype=jnp.float32)
    # low-res mask; forward nearest-upsamples and binarizes (>= 1.0) it
    mask = (jax.random.uniform(keys[1], (B, 1, H // 2, W // 2)) > 0.5
            ).astype(jnp.float32)

    def winit(k, shape, scale=0.1):
        return scale * jax.random.normal(k, shape, dtype=jnp.float32)

    params = {
        "w1": winit(keys[2], (Cout // 4, Cin)),
        "b1": winit(keys[3], (Cout // 4,)),
        "w2": winit(keys[4], (Cout // 2, Cout // 4)),
        "b2": winit(keys[5], (Cout // 2,)),
        "w3": winit(keys[6], (Cout, Cout // 2)),
        "b3": winit(keys[7], (Cout,)),
    }

    out = jax.block_until_ready(colornet_forward(x, mask, params))
    ref = jax.block_until_ready(reference(x, mask, params))

    assert out.shape == (B, Cout, 1, 1)
    # conv2/conv3 use bf16 MXU operands (f32 accumulation) -> relaxed tolerance
    assert jnp.allclose(out, ref, rtol=2e-2, atol=1e-3), "mismatch vs reference"

    print("KERNEL_OK")
</pallas_src>

<mosaic_0001>
module attributes {stable_mosaic.version = 11 : i64} {
  func.func @colornet_kernel(%arg0: i32, %arg1: i32, %arg2: i32, %arg3: memref<1x2x256xf32, #tpu.memory_space<vmem>>, %arg4: memref<1x1x256xbf16, #tpu.memory_space<vmem>>, %arg5: memref<32x2xf32, #tpu.memory_space<vmem>>, %arg6: memref<32x1xf32, #tpu.memory_space<vmem>>, %arg7: memref<64x32xbf16, #tpu.memory_space<vmem>>, %arg8: memref<64x1xf32, #tpu.memory_space<vmem>>, %arg9: memref<128x64xbf16, #tpu.memory_space<vmem>>, %arg10: memref<128x1xf32, #tpu.memory_space<vmem>>, %arg11: memref<1x1x128x128xf32, #tpu.memory_space<vmem>>, %arg12: memref<128x128xf32, #tpu.memory_space<vmem>>) attributes {dimension_semantics = [#tpu.dimension_semantics<parallel>, #tpu.dimension_semantics<parallel>, #tpu.dimension_semantics<arbitrary>], iteration_bounds = array<i64: 2, 1, 1>, scalar_prefetch = 0 : i64, scratch_operands = 1 : i64, tpu.core_type = #tpu.core_type<tc>, window_params = [{transform_indices = @transform_0, window_bounds = array<i64: 1, 2, 256>}, {transform_indices = @transform_1, window_bounds = array<i64: 1, 1, 256>}, {pipeline_mode = #tpu.pipeline_mode<synchronous>, transform_indices = @transform_2, window_bounds = array<i64: 32, 2>}, {pipeline_mode = #tpu.pipeline_mode<synchronous>, transform_indices = @transform_3, window_bounds = array<i64: 32, 1>}, {pipeline_mode = #tpu.pipeline_mode<synchronous>, transform_indices = @transform_4, window_bounds = array<i64: 64, 32>}, {pipeline_mode = #tpu.pipeline_mode<synchronous>, transform_indices = @transform_5, window_bounds = array<i64: 64, 1>}, {pipeline_mode = #tpu.pipeline_mode<synchronous>, transform_indices = @transform_6, window_bounds = array<i64: 128, 64>}, {pipeline_mode = #tpu.pipeline_mode<synchronous>, transform_indices = @transform_7, window_bounds = array<i64: 128, 1>}, {transform_indices = @transform_8, window_bounds = array<i64: 1, 1, 128, 128>}]} {
    %c0_i32 = arith.constant 0 : i32
    %0 = arith.cmpi eq, %arg2, %c0_i32 : i32
    %1 = arith.extui %0 : i1 to i32
    %c0_i32_0 = arith.constant 0 : i32
    %2 = arith.cmpi ne, %1, %c0_i32_0 : i32
    scf.if %2 {
      %cst_28 = arith.constant 0.000000e+00 : f32
      %52 = vector.broadcast %cst_28 : f32 to vector<128x128xf32>
      %c0_29 = arith.constant 0 : index
      %c0_30 = arith.constant 0 : index
      %53 = vector.load %arg12[%c0_29, %c0_30] : memref<128x128xf32, #tpu.memory_space<vmem>>, vector<128x128xf32>
      tpu.vector_store %arg12[%c0_29, %c0_30], %52 {strides = array<i32>} : memref<128x128xf32, #tpu.memory_space<vmem>>, vector<128x128xf32>,
    } else {
    }
    %c0 = arith.constant 0 : index
    %c0_1 = arith.constant 0 : index
    %c0_2 = arith.constant 0 : index
    %3 = vector.load %arg3[%c0, %c0_1, %c0_2] : memref<1x2x256xf32, #tpu.memory_space<vmem>>, vector<1x2x256xf32>
    %4 = vector.shape_cast %3 : vector<1x2x256xf32> to vector<2x256xf32>
    %c0_3 = arith.constant 0 : index
    %c0_4 = arith.constant 0 : index
    %c0_5 = arith.constant 0 : index
    %5 = vector.load %arg4[%c0_3, %c0_4, %c0_5] : memref<1x1x256xbf16, #tpu.memory_space<vmem>>, vector<1x1x256xbf16>
    %6 = vector.shape_cast %5 : vector<1x1x256xbf16> to vector<1x256xbf16>
    %7 = arith.extf %6 : vector<1x256xbf16> to vector<1x256xf32>
    %c0_6 = arith.constant 0 : index
    %c0_7 = arith.constant 0 : index
    %8 = vector.load %arg5[%c0_6, %c0_7] : memref<32x2xf32, #tpu.memory_space<vmem>>, vector<32x2xf32>
    %9 = vector.extract_strided_slice %8 {offsets = [0, 0], sizes = [32, 1], strides = [1, 1]} : vector<32x2xf32> to vector<32x1xf32>
    %10 = vector.extract_strided_slice %4 {offsets = [0, 0], sizes = [1, 256], strides = [1, 1]} : vector<2x256xf32> to vector<1x256xf32>
    %11 = vector.broadcast %9 : vector<32x1xf32> to vector<32x256xf32>
    %12 = vector.broadcast %10 : vector<1x256xf32> to vector<32x256xf32>
    %13 = arith.mulf %11, %12 : vector<32x256xf32>
    %14 = vector.extract_strided_slice %8 {offsets = [0, 1], sizes = [32, 1], strides = [1, 1]} : vector<32x2xf32> to vector<32x1xf32>
    %15 = vector.extract_strided_slice %4 {offsets = [1, 0], sizes = [1, 256], strides = [1, 1]} : vector<2x256xf32> to vector<1x256xf32>
    %16 = vector.broadcast %14 : vector<32x1xf32> to vector<32x256xf32>
    %17 = vector.broadcast %15 : vector<1x256xf32> to vector<32x256xf32>
    %18 = arith.mulf %16, %17 : vector<32x256xf32>
    %19 = arith.addf %13, %18 : vector<32x256xf32>
    %c0_8 = arith.constant 0 : index
    %c0_9 = arith.constant 0 : index
    %20 = vector.load %arg6[%c0_8, %c0_9] : memref<32x1xf32, #tpu.memory_space<vmem>>, vector<32x1xf32>
    %21 = vector.broadcast %20 : vector<32x1xf32> to vector<32x256xf32>
    %22 = arith.addf %19, %21 : vector<32x256xf32>
    %cst = arith.constant 0.000000e+00 : f32
    %23 = vector.broadcast %cst : f32 to vector<32x256xf32>
    %24 = arith.maximumf %22, %23 : vector<32x256xf32>
    %c0_10 = arith.constant 0 : index
    %c0_11 = arith.constant 0 : index
    %25 = vector.load %arg7[%c0_10, %c0_11] : memref<64x32xbf16, #tpu.memory_space<vmem>>, vector<64x32xbf16>
    %26 = arith.truncf %24 : vector<32x256xf32> to vector<32x256xbf16>
    %cst_12 = arith.constant dense<0.000000e+00> : vector<64x256xf32>
    %27 = tpu.matmul %25, %26, %cst_12 {dimension_numbers = #tpu.dot_dimension_numbers<[1], [0], [0], [1], [0, 0, 1, 1], [], []>} : vector<64x32xbf16>, vector<32x256xbf16>, vector<64x256xf32> -> vector<64x256xf32>
    %c0_13 = arith.constant 0 : index
    %c0_14 = arith.constant 0 : index
    %28 = vector.load %arg8[%c0_13, %c0_14] : memref<64x1xf32, #tpu.memory_space<vmem>>, vector<64x1xf32>
    %29 = vector.broadcast %28 : vector<64x1xf32> to vector<64x256xf32>
    %30 = arith.addf %27, %29 : vector<64x256xf32>
    %cst_15 = arith.constant 0.000000e+00 : f32
    %31 = vector.broadcast %cst_15 : f32 to vector<64x256xf32>
    %32 = arith.maximumf %30, %31 : vector<64x256xf32>
    %c0_16 = arith.constant 0 : index
    %c0_17 = arith.constant 0 : index
    %33 = vector.load %arg9[%c0_16, %c0_17] : memref<128x64xbf16, #tpu.memory_space<vmem>>, vector<128x64xbf16>
    %34 = arith.truncf %32 : vector<64x256xf32> to vector<64x256xbf16>
    %cst_18 = arith.constant dense<0.000000e+00> : vector<128x256xf32>
    %35 = tpu.matmul %33, %34, %cst_18 {dimension_numbers = #tpu.dot_dimension_numbers<[1], [0], [0], [1], [0, 0, 1, 1], [], []>} : vector<128x64xbf16>, vector<64x256xbf16>, vector<128x256xf32> -> vector<128x256xf32>
    %c0_19 = arith.constant 0 : index
    %c0_20 = arith.constant 0 : index
    %36 = vector.load %arg10[%c0_19, %c0_20] : memref<128x1xf32, #tpu.memory_space<vmem>>, vector<128x1xf32>
    %37 = vector.broadcast %36 : vector<128x1xf32> to vector<128x256xf32>
    %38 = arith.addf %35, %37 : vector<128x256xf32>
    %cst_21 = arith.constant 0.000000e+00 : f32
    %39 = vector.broadcast %cst_21 : f32 to vector<128x256xf32>
    %40 = arith.maximumf %38, %39 : vector<128x256xf32>
    %41 = vector.broadcast %7 : vector<1x256xf32> to vector<128x256xf32>
    %42 = arith.mulf %40, %41 : vector<128x256xf32>
    %43 = vector.extract_strided_slice %42 {offsets = [0, 0], sizes = [128, 128], strides = [1, 1]} : vector<128x256xf32> to vector<128x128xf32>
    %44 = vector.extract_strided_slice %42 {offsets = [0, 128], sizes = [128, 128], strides = [1, 1]} : vector<128x256xf32> to vector<128x128xf32>
    %45 = arith.addf %43, %44 : vector<128x128xf32>
    %c0_22 = arith.constant 0 : index
    %c0_23 = arith.constant 0 : index
    %46 = vector.load %arg12[%c0_22, %c0_23] : memref<128x128xf32, #tpu.memory_space<vmem>>, vector<128x128xf32>
    %47 = arith.addf %46, %45 : vector<128x128xf32>
    %c0_24 = arith.constant 0 : index
    %c0_25 = arith.constant 0 : index
    %48 = vector.load %arg12[%c0_24, %c0_25] : memref<128x128xf32, #tpu.memory_space<vmem>>, vector<128x128xf32>
    tpu.vector_store %arg12[%c0_24, %c0_25], %47 {strides = array<i32>} : memref<128x128xf32, #tpu.memory_space<vmem>>, vector<128x128xf32>,
    %c0_i32_26 = arith.constant 0 : i32
    %49 = arith.cmpi eq, %arg2, %c0_i32_26 : i32
    %50 = arith.extui %49 : i1 to i32
    %c0_i32_27 = arith.constant 0 : i32
    %51 = arith.cmpi ne, %50, %c0_i32_27 : i32
    scf.if %51 {
      %c0_28 = arith.constant 0 : index
      %c0_29 = arith.constant 0 : index
      %52 = vector.load %arg12[%c0_28, %c0_29] : memref<128x128xf32, #tpu.memory_space<vmem>>, vector<128x128xf32>
      %cst_30 = arith.constant 3.906250e-03 : f32
      %53 = vector.broadcast %cst_30 : f32 to vector<128x128xf32>
      %54 = arith.mulf %52, %53 : vector<128x128xf32>
      %c0_31 = arith.constant 0 : index
      %c0_32 = arith.constant 0 : index
      %c0_33 = arith.constant 0 : index
      %c0_34 = arith.constant 0 : index
      %55 = vector.load %arg11[%c0_31, %c0_32, %c0_33, %c0_34] : memref<1x1x128x128xf32, #tpu.memory_space<vmem>>, vector<1x1x128x128xf32>
      %56 = vector.shape_cast %55 : vector<1x1x128x128xf32> to vector<128x128xf32>
      %57 = vector.shape_cast %54 : vector<128x128xf32> to vector<1x1x128x128xf32>
      tpu.vector_store %arg11[%c0_31, %c0_32, %c0_33, %c0_34], %57 {strides = array<i32>} : memref<1x1x128x128xf32, #tpu.memory_space<vmem>>, vector<1x1x128x128xf32>,
    } else {
    }
    return
  }
  func.func @transform_0(%arg0: i32, %arg1: i32, %arg2: i32) -> (i32, i32, i32) {
    %c1_i32 = arith.constant 1 : i32
    %0 = arith.muli %arg1, %c1_i32 : i32
    %1 = arith.addi %0, %arg2 : i32
    %c0_i32 = arith.constant 0 : i32
    %c0_i32_0 = arith.constant 0 : i32
    return %arg0, %c0_i32, %1 : i32, i32, i32
  }
  func.func @transform_1(%arg0: i32, %arg1: i32, %arg2: i32) -> (i32, i32, i32) {
    %c1_i32 = arith.constant 1 : i32
    %0 = arith.muli %arg1, %c1_i32 : i32
    %1 = arith.addi %0, %arg2 : i32
    %c0_i32 = arith.constant 0 : i32
    %c0_i32_0 = arith.constant 0 : i32
    return %arg0, %c0_i32, %1 : i32, i32, i32
  }
  func.func @transform_2(%arg0: i32, %arg1: i32, %arg2: i32) -> (i32, i32) {
    %c0_i32 = arith.constant 0 : i32
    %c0_i32_0 = arith.constant 0 : i32
    %c0_i32_1 = arith.constant 0 : i32
    return %c0_i32, %c0_i32_0 : i32, i32
  }
  func.func @transform_3(%arg0: i32, %arg1: i32, %arg2: i32) -> (i32, i32) {
    %c0_i32 = arith.constant 0 : i32
    %c0_i32_0 = arith.constant 0 : i32
    %c0_i32_1 = arith.constant 0 : i32
    return %c0_i32, %c0_i32_0 : i32, i32
  }
  func.func @transform_4(%arg0: i32, %arg1: i32, %arg2: i32) -> (i32, i32) {
    %c0_i32 = arith.constant 0 : i32
    %c0_i32_0 = arith.constant 0 : i32
    %c0_i32_1 = arith.constant 0 : i32
    return %c0_i32, %c0_i32_0 : i32, i32
  }
  func.func @transform_5(%arg0: i32, %arg1: i32, %arg2: i32) -> (i32, i32) {
    %c0_i32 = arith.constant 0 : i32
    %c0_i32_0 = arith.constant 0 : i32
    %c0_i32_1 = arith.constant 0 : i32
    return %c0_i32, %c0_i32_0 : i32, i32
  }
  func.func @transform_6(%arg0: i32, %arg1: i32, %arg2: i32) -> (i32, i32) {
    %c0_i32 = arith.constant 0 : i32
    %c0_i32_0 = arith.constant 0 : i32
    %c0_i32_1 = arith.constant 0 : i32
    return %c0_i32, %c0_i32_0 : i32, i32
  }
  func.func @transform_7(%arg0: i32, %arg1: i32, %arg2: i32) -> (i32, i32) {
    %c0_i32 = arith.constant 0 : i32
    %c0_i32_0 = arith.constant 0 : i32
    %c0_i32_1 = arith.constant 0 : i32
    return %c0_i32, %c0_i32_0 : i32, i32
  }
  func.func @transform_8(%arg0: i32, %arg1: i32, %arg2: i32) -> (i32, i32, i32, i32) {
    %c0_i32 = arith.constant 0 : i32
    %c0_i32_0 = arith.constant 0 : i32
    %c0_i32_1 = arith.constant 0 : i32
    return %arg0, %arg1, %c0_i32, %c0_i32_0 : i32, i32, i32, i32
  }
}

</mosaic_0001>

<bundles_post_ra>
// kernel: tpu_custom_call.1
= control target key start
LH: loop header
LB: loop body
LE: loop exit
PB: predicated region body
PF: predicated region fallthrough
CT: control target
= control target key end

     0   :  { %13 = vsyncpa [#allocation4], 0  ;;  %s1957_s0 = inlined_call_operand.vmem [shape: f32[2,2,256], index: 0, kind: input, shape index: {}]   ;;  %s1958_s1 = inlined_call_operand.vmem [shape: bf16[2,1,256], index: 1, kind: input, shape index: {}]   ;;  %s1959_s2 = inlined_call_operand.vmem [shape: f32[32,2], index: 2, kind: input, shape index: {}]   ;;  %s1960_s3 = inlined_call_operand.vmem [shape: f32[32,1], index: 3, kind: input, shape index: {}]   ;;  %s1961_s4 = inlined_call_operand.vmem [shape: bf16[64,32], index: 4, kind: input, shape index: {}]   ;;  %s1962_s5 = inlined_call_operand.vmem [shape: f32[64,1], index: 5, kind: input, shape index: {}]   ;;  %s1963_s6 = inlined_call_operand.vmem [shape: bf16[128,64], index: 6, kind: input, shape index: {}]   ;;  %s1964_s7 = inlined_call_operand.vmem [shape: f32[128,1], index: 7, kind: input, shape index: {}]   ;;  %s1965_s8 = inlined_call_operand.hbm [shape: f32[2,1,128,128], index: 8, kind: output, shape index: {}]  }
   0x1   :  { %15 = vsyncpa [#allocation4 + $0x1], 0  ;;  %s1597_s27 = smov 0   ;;  %s1599_s28 = smov 0  }
   0x2   :  { %s1601_s29 = smov 0   ;;  %s1603_s30 = smov 0  }
   0x3   :  { %s1605_s9 = smov 0   ;;  %s1607_s10 = smov 0  }
   0x4 LB: > { %s1344_s11 = sadd.s32 4294967295, %s1545_s10   ;;  %s1345_s12 = sadd.s32 4294967294, %s1545_s10   ;;  %s1545_s10 = sphi %s1607_s10, %s21_s10   ;;  %s1541_s9 = sphi %s1605_s9, %s1972_s9   ;;  %s1537_s30 = sphi %s1603_s30, %s1971_s30   ;;  %s1533_s29 = sphi %s1601_s29, %s1970_s29   ;;  %s1529_s28 = sphi %s1599_s28, %s1969_s28   ;;  %s1525_s27 = sphi %s1597_s27, %s1968_s27  }
   0x5   : > { %s40_s13 = sadd.s32 1, %s1541_s9  ;;  %s235_s14 = sadd.s32 1, %s1533_s29 }
   0x6   : > { %p42_p0 = scmp.ge.s32.totalorder %s40_s13, 2  ;;  %p245_p1 = scmp.ne.s32.totalorder %s1533_s29, %s1529_s28 }
   0x7   : > { %p246_p2 = scmp.eq.s32.totalorder %s1344_s11, 1  ;;  %p251_p3 = scmp.ne.s32.totalorder %s1529_s28, %s1525_s27 }
   0x8   : > { %s1974_s13 = smov (%p42_p0, %s40_s13), 0  ;;  %p252_p5 = scmp.eq.s32.totalorder %s1345_s12, 1 }
   0x9   : > { %p1637_p4 = por %p246_p2, %p245_p1  ;;  %s230_s16 = ssub.s32 %s1541_s9, %s1974_s13 }
   0xa   : > { %p1348_p6 = scmp.ge.s32.totalorder %s1545_s10, 1  ;;  %p233_p7 = scmp.eq.s32.totalorder %s230_s16, 0 }
   0xb   : > { %p1644_p8 = por %p252_p5, %p251_p3  ;;  %p317_p9 = scmp.lt.s32.totalorder %s1545_s10, 3 }
   0xc   : > { %s1650_s18 = scalar_select %p233_p7, %s1533_s29, %s235_s14  }
   0xd   : > { %p318_p10 = pnand %p1348_p6, %p317_p9 }
   0xe   : > { %p367_p11 = scmp.lt.s32.totalorder (!%p318_p10), %s1537_s30, 1  ;;  %s1383_s12 = sshll.u32 (!%p318_p10), %s1537_s30, 11 }
   0xf   : > { %321 = sbr.rel (%p318_p10) target bundleno = 691 (0x2b3), region = 52  ;;  %s1905_s20 = scalar_lea.hbm (!%p318_p10), %s1965_s8, %s1383_s12 }
  0x14   : > { %v414_v0 = vld [vmem:[%s1959_s2 + $0x10] sm:$0xff]  ;;  %v412_v1 = vld [vmem:[%s1959_s2] sm:$0xff]  ;;  %v1547_v2 = vmov 1   ;;  %v415_v3 = vld [vmem:[%s1959_s2 + $0x18] sm:$0xff]  ;;  %s1663_s25 = scalar_select %p367_p11, %s1537_s30, 1  ;;  %v1548_v4 = vmov 0   ;;  %v437_v5 = vlaneseq }
  0x15   : > { %1453 = vset.pattern.permute.xlu0 %v1547_v2  ;;  %1451 = vset.pattern.permute.xlu1 %v1547_v2  ;;  %v413_v6 = vld [vmem:[%s1959_s2 + $0x8] sm:$0xff]  ;;  %v516_v12 = vld [vmem:[%s1960_s3 + $0x18] sm:$0xff]  ;;  %v515_v15 = vld [vmem:[%s1960_s3 + $0x10] sm:$0xff]  ;;  %vm633_vm0 = vcmask 261120   ;;  %vm895_vm1 = vcmask 523264   ;;  %s1549_s30 = smov [#allocation3]  }
  0x16   : > { %472 = vperm.xlu1 %1451, %v414_v0   ;;  %464 = vperm.xlu0 %1453, %v412_v1   ;;  %s1352_s26 = sshll.u32 %s1663_s25, 1  ;;  %v1672_v7 = vshrl.u32 %v437_v5, 7  ;;  %v571_v18 = vld [vmem:[%s1962_s5 + $0x30] sm:$0xff]  ;;  %v513_v19 = vld [vmem:[%s1960_s3] sm:$0xff]  ;;  %v514_v21 = vld [vmem:[%s1960_s3 + $0x8] sm:$0xff]  ;;  %s1382_s21 = sshll.u32 %s1663_s25, 2 }
  0x17   : > { %678 = vmatprep.mubr.bf16.mxu0 %v1548_v4  ;;  %972 = vmatprep.mubr.bf16.mxu1 %v1548_v4  ;;  %s385_s19 = scalar_lea.vmem %s1958_s1, %s1352_s26  ;;  %v569_v20 = vld [vmem:[%s1962_s5 + $0x20] sm:$0xff]  ;;  %v567_v22 = vld [vmem:[%s1962_s5 + $0x10] sm:$0xff]  ;;  %v572_v23 = vld [vmem:[%s1962_s5 + $0x38] sm:$0xff]  ;;  %s374_s24 = scalar_lea.vmem %s1957_s0, %s1382_s21 }
  0x18   : > { %v1679_v8 = vsub.s32 0, %v1672_v7  ;;  %v443_v9 = vsub.s32 2, %v1672_v7  ;;  %v410_v10 = vld [vmem:[%s385_s19] sm:$0x3]  ;;  %v570_v25 = vld [vmem:[%s1962_s5 + $0x28] sm:$0xff]  ;;  %v568_v27 = vld [vmem:[%s1962_s5 + $0x18] sm:$0xff] }
  0x19   : > { %v411_v11 = vunpack.c.l.bf16 %v410_v10  ;;  %v565_v24 = vld [vmem:[%s1962_s5] sm:$0xff]  ;;  %v761_v28 = vld [vmem:[%s1964_s7 + $0x10] sm:$0xff]  ;;  %v566_v29 = vld [vmem:[%s1962_s5 + $0x8] sm:$0xff]  ;;  %v481_v46 = vsub.s32 1, %v1672_v7  ;;  %v485_v47 = vsub.s32 3, %v1672_v7  ;;  %s362_s25 = sand.u32 1, %s1529_s28  }
  0x1a   : > { %476 = vperm.xlu1 %1451, %v415_v3   ;;  %1454 = vset.pattern.permute.xlu0 %v1548_v4  ;;  %v759_v26 = vld [vmem:[%s1964_s7] sm:$0xff]  ;;  %v760_v31 = vld [vmem:[%s1964_s7 + $0x8] sm:$0xff]  ;;  %v765_v32 = vld [vmem:[%s1964_s7 + $0x30] sm:$0xff]  ;;  %s1848_s26 = sshll.u32 %s362_s25, 7  ;;  %s1912_s21 = scalar_lea.sflag [#allocation4], %s362_s25 }
  0x1b   : > { %428 = vperm.xlu0 %1454, %v414_v0   ;;  %v1069_v13 = vrot.slane %v411_v11, %v1679_v8  ;;  %v1073_v14 = vrot.slane %v411_v11, %v443_v9  ;;  %v763_v30 = vld [vmem:[%s1964_s7 + $0x20] sm:$0xff]  ;;  %v762_v33 = vld [vmem:[%s1964_s7 + $0x18] sm:$0xff]  ;;  %v764_v35 = vld [vmem:[%s1964_s7 + $0x28] sm:$0xff]  ;;  %s1857_s11 = scalar_lea.vmem [#allocation3], %s1848_s26  ;;  %s1473_s23 = sshll.u32 %s1549_s30, 4  ;;  %s1474_s23 = int_to_ptr.vmem [resolvable:$false] %s1473_s23 }
  0x1c   : > { %v767_v34 = vld [vmem:[%s1964_s7 + $0x40] sm:$0xff]  ;;  %v769_v36 = vld [vmem:[%s1964_s7 + $0x50] sm:$0xff]  ;;  %v766_v37 = vld [vmem:[%s1964_s7 + $0x38] sm:$0xff]  ;;  %s1247_s14 = sshll.u32 %s1857_s11, 4  ;;  %s1907_s14 = int_to_ptr.vmem [resolvable:$true] %s1247_s14 }
  0x1d   : > { %v1692_v16 = vrot.slane %v1069_v13, %v1679_v8  ;;  %v1695_v17 = vrot.slane %v1073_v14, %v1679_v8  ;;  %v771_v38 = vld [vmem:[%s1964_s7 + $0x60] sm:$0xff]  ;;  %v768_v39 = vld [vmem:[%s1964_s7 + $0x48] sm:$0xff]  ;;  %v773_v40 = vld [vmem:[%s1964_s7 + $0x70] sm:$0xff]  ;;  %s1469_s22 = scalar_lea.vmem %s1907_s14, 2048  ;;  %p1476_p1 = scmp.lt.s32.totalorder %s1907_s14, %s1474_s23 }
  0x1e   : > { %1452 = vset.pattern.permute.xlu1 %v1548_v4  ;;  %v770_v41 = vld [vmem:[%s1964_s7 + $0x58] sm:$0xff]  ;;  %v772_v42 = vld [vmem:[%s1964_s7 + $0x68] sm:$0xff]  ;;  %v409_v49 = vld [vmem:[%s374_s24] sm:$0xf]  ;;  %p1470_p12 = scmp.ne.s32.totalorder %s1907_s14, %s1469_s22  ;;  %s1475_s24 = scalar_lea.vmem %s1474_s23, 4096 }
  0x1f   : > { %423 = vperm.xlu1 %1452, %v413_v6   ;;  %433 = vperm.xlu0 %1454, %v415_v3   ;;  %v774_v43 = vld [vmem:[%s1964_s7 + $0x78] sm:$0xff]  ;;  %v440_v51 = vrot.slane %v409_v49, %v1679_v8  ;;  %v444_v52 = vrot.slane %v409_v49, %v443_v9  ;;  %v482_v53 = vrot.slane %v409_v49, %v481_v46  ;;  %p1477_p2 = scmp.lt.s32.totalorder %s1475_s24, %s1469_s22 }
  0x20   : > { %v486_v54 = vrot.slane %v409_v49, %v485_v47  ;;  %p1471_p13 = pnand %p1470_p12, %p1637_p4 }
  0x21   : > { %v450_v57 = vrot.slane %v440_v51, %v1679_v8  ;;  %v454_v58 = vrot.slane %v444_v52, %v1679_v8  ;;  %v492_v59 = vrot.slane %v482_v53, %v481_v46  ;;  %v1458_v51 = vld [vmem:[%s1961_s4 + $0x8] sm:$0xff]   ;;  %v1459_v52 = vld [vmem:[%s1961_s4 + $0x10] sm:$0xff]   ;;  %v1460_v53 = vld [vmem:[%s1961_s4 + $0x18] sm:$0xff]   ;;  %p1478_p3 = por %p1477_p2, %p1476_p1 }
  0x22   : > { %v496_v60 = vrot.slane %v486_v54, %v481_v46  ;;  %p1472_p0 = pneg %p1471_p13 }
  0x23   : > { %1455 = vset.pattern.permute.xlu1 %v1547_v2  ;;  %418 = vperm.xlu0 %1454, %v412_v1  }
  0x24   : > { %468 = vperm.xlu1 %1455, %v413_v6   ;;  %p1479_p5 = pnand %p1478_p3, %p1472_p0 }
  0x27   : > { %534 = vperm.xlu0 %1454, %v516_v12  }
  0x28   : > { %1456 = vset.pattern.permute.xlu1 %v1548_v4 }
  0x29   : > { %529 = vperm.xlu1 %1456, %v515_v15  }
  0x2b   : > { %605 = vperm.xlu0 %1454, %v571_v18  }
  0x2d   : > { %519 = vperm.xlu1 %1456, %v513_v19  }
  0x2f   : > { %595 = vperm.xlu0 %1454, %v569_v20  }
  0x31   : > { %524 = vperm.xlu1 %1456, %v514_v21  }
  0x33   : > { %585 = vperm.xlu0 %1454, %v567_v22  }
  0x35   : > { %610 = vperm.xlu1 %1456, %v572_v23  }
  0x37   : > { %575 = vperm.xlu0 %1454, %v565_v24  }
  0x39   : > { %600 = vperm.xlu1 %1456, %v570_v25  }
  0x3b   : > { %777 = vperm.xlu0 %1454, %v759_v26  }
  0x3d   : > { %590 = vperm.xlu1 %1456, %v568_v27  }
  0x3f   : > { %787 = vperm.xlu0 %1454, %v761_v28  }
  0x41   : > { %580 = vperm.xlu1 %1456, %v566_v29  }
  0x43   : > { %797 = vperm.xlu0 %1454, %v763_v30  }
  0x45   : > { %782 = vperm.xlu1 %1456, %v760_v31  }
  0x47   : > { %807 = vperm.xlu0 %1454, %v765_v32  }
  0x49   : > { %792 = vperm.xlu1 %1456, %v762_v33  }
  0x4b   : > { %817 = vperm.xlu0 %1454, %v767_v34  }
  0x4d   : > { %802 = vperm.xlu1 %1456, %v764_v35  }
  0x4f   : > { %827 = vperm.xlu0 %1454, %v769_v36  }
  0x51   : > { %812 = vperm.xlu1 %1456, %v766_v37  }
  0x53   : > { %837 = vperm.xlu0 %1454, %v771_v38  }
  0x55   : > { %822 = vperm.xlu1 %1456, %v768_v39  }
  0x57   : > { %847 = vperm.xlu0 %1454, %v773_v40  }
  0x59   : > { %832 = vperm.xlu1 %1456, %v770_v41  }
  0x5d   : > { %842 = vperm.xlu1 %1456, %v772_v42  }
  0x61   : > { %852 = vperm.xlu1 %1456, %v774_v43  }
  0x91   : > { %v473_v44 = vpop.permute.xlu1 %472  ;;  %v465_v45 = vpop.permute.xlu0 %464 }
  0x92   : > { %v501_v6 = vmul.f32 %v492_v59, %v473_v44  ;;  %v502_v7 = vmul.f32 %v496_v60, %v473_v44  ;;  %v497_v22 = vmul.f32 %v492_v59, %v465_v45  ;;  %v498_v23 = vmul.f32 %v496_v60, %v465_v45 }
  0x95   : > { %v477_v48 = vpop.permute.xlu1 %476 }
  0x96   : > { %v429_v50 = vpop.permute.xlu0 %428  ;;  %v503_v0 = vmul.f32 %v492_v59, %v477_v48  ;;  %v504_v1 = vmul.f32 %v496_v60, %v477_v48 }
  0x97   : > { %v459_v2 = vmul.f32 %v450_v57, %v429_v50  ;;  %v460_v3 = vmul.f32 %v454_v58, %v429_v50  ;;  %v1457_v50 = vld [vmem:[%s1961_s4] sm:$0xff]  }
  0x99   : > { %v509_v14 = vadd.f32 %v501_v6, %v459_v2  ;;  %v510_v15 = vadd.f32 %v502_v7, %v460_v3 }
  0x9a   : > { %v424_v55 = vpop.permute.xlu1 %423  ;;  %v434_v56 = vpop.permute.xlu0 %433 }
  0x9b   : > { %v461_v61 = vmul.f32 %v450_v57, %v434_v56  ;;  %v462_v62 = vmul.f32 %v454_v58, %v434_v56  ;;  %v457_v30 = vmul.f32 %v450_v57, %v424_v55  ;;  %v458_v31 = vmul.f32 %v454_v58, %v424_v55 }
  0x9d   : > { %v511_v9 = vadd.f32 %v503_v0, %v461_v61  ;;  %v512_v10 = vadd.f32 %v504_v1, %v462_v62 }
  0x9e   : > { %v419_v63 = vpop.permute.xlu0 %418 }
  0x9f   : > { %v469_v5 = vpop.permute.xlu1 %468  ;;  %v455_v18 = vmul.f32 %v450_v57, %v419_v63  ;;  %v456_v19 = vmul.f32 %v454_v58, %v419_v63 }
  0xa0   : > { %v499_v24 = vmul.f32 %v492_v59, %v469_v5  ;;  %v500_v25 = vmul.f32 %v496_v60, %v469_v5 }
  0xa1   : > { %v505_v33 = vadd.f32 %v497_v22, %v455_v18  ;;  %v506_v34 = vadd.f32 %v498_v23, %v456_v19 }
  0xa2   : > { %v535_v11 = vpop.permute.xlu0 %534  ;;  %v507_v39 = vadd.f32 %v499_v24, %v457_v30  ;;  %v508_v40 = vadd.f32 %v500_v25, %v458_v31 }
  0xa3   : > { %v543_v12 = vadd.f32 %v535_v11, %v511_v9  ;;  %v544_v13 = vadd.f32 %v535_v11, %v512_v10 }
  0xa4   : > { %v530_v8 = vpop.permute.xlu1 %529 }
  0xa5   : > { %v541_v20 = vadd.f32 %v530_v8, %v509_v14  ;;  %v542_v21 = vadd.f32 %v530_v8, %v510_v15  ;;  %v551_v26 = vmax.f32 %v543_v12, 0.0  ;;  %v552_v29 = vmax.f32 %v544_v13, 0.0 }
  0xa6   : > { %v606_v1 = vpop.permute.xlu0 %605 }
  0xa7   : > { %v549_v27 = vmax.f32 %v541_v20, 0.0  ;;  %v550_v28 = vmax.f32 %v542_v21, 0.0 }
  0xa8   : > { %v520_v32 = vpop.permute.xlu1 %519 }
  0xa9   : > { %v564_v35 = vpack.c.bf16 %v552_v29, %v550_v28  ;;  %v563_v36 = vpack.c.bf16 %v551_v26, %v549_v27  ;;  %v537_v37 = vadd.f32 %v520_v32, %v505_v33  ;;  %v538_v38 = vadd.f32 %v520_v32, %v506_v34 }
  0xaa   : > { %v596_v7 = vpop.permute.xlu0 %595 }
  0xab   : > { %658 = vmatprep.subr.bf16.mxu0 %v564_v35  ;;  %v545_v44 = vmax.f32 %v537_v37, 0.0  ;;  %v546_v45 = vmax.f32 %v538_v38, 0.0 }
  0xac   : > { %v525_v41 = vpop.permute.xlu1 %524  ;;  %659 = vmatpush1.bf16.msra.mxu0 %v563_v36 }
  0xad   : > { %v539_v42 = vadd.f32 %v525_v41, %v507_v39  ;;  %v540_v43 = vadd.f32 %v525_v41, %v508_v40 }
  0xae   : > { %v586_v20 = vpop.permute.xlu0 %585 }
  0xaf   : > { %v547_v46 = vmax.f32 %v539_v42, 0.0  ;;  %v548_v47 = vmax.f32 %v540_v43, 0.0 }
  0xb0   : > { %v611_v63 = vpop.permute.xlu1 %610 }
  0xb1   : > { %v562_v48 = vpack.c.bf16 %v548_v47, %v546_v45  ;;  %v561_v49 = vpack.c.bf16 %v547_v46, %v545_v44 }
  0xb2   : > { %v576_v39 = vpop.permute.xlu0 %575 }
  0xb3   : > { %660 = vmatprep.subr.bf16.mxu0 %v562_v48 }
  0xb4   : > { %661 = vmatpush1.bf16.msra.mxu0 %v561_v49  ;;  %v601_v5 = vpop.permute.xlu1 %600 }
  0xb7   : > { %1357 = vmatmul.mubr.msk.bf16.vlgmr.msra.gmra.mxu0 %vm633_vm0, %v1457_v50 }
  0xb8   : > { %688 = vmatprep.mubr.bf16.mxu0 %v1548_v4  ;;  %v591_v14 = vpop.permute.xlu1 %590 }
  0xbc   : > { %v581_v32 = vpop.permute.xlu1 %580 }
  0xbf   : > { %1358 = vmatmul.mubr.msk.bf16.gmra.mxu0 %vm633_vm0, %v1458_v51 }
  0xc0   : > { %698 = vmatprep.mubr.bf16.mxu0 %v1548_v4 }
  0xc7   : > { %1359 = vmatmul.mubr.msk.bf16.gmra.mxu0 %vm633_vm0, %v1459_v52 }
  0xc8   : > { %708 = vmatprep.mubr.bf16.mxu0 %v1548_v4 }
  0xcf   : > { %1360 = vmatmul.mubr.msk.bf16.gmra.mxu0 %vm633_vm0, %v1460_v53 }
  0xd0   : > { %952 = vmatprep.mubr.bf16.mxu0 %v1548_v4 }
 0x177   : > { %v680_v54 = vpop.f32.mrf.mxu0 }
 0x178   : > { %v681_v49 = vadd.f32 %v680_v54, %v576_v39  ;;  %v1462_v54 = vld [vmem:[%s1963_s6 + $0x10] sm:$0xff]  }
 0x179   : > { %v682_v55 = vpop.f32.mrf.mxu0 }
 0x17a   : > { %v683_v42 = vadd.f32 %v682_v55, %v576_v39 }
 0x17b   : > { %v684_v56 = vpop.f32.mrf.mxu0 }
 0x17c   : > { %v685_v44 = vadd.f32 %v684_v56, %v581_v32  ;;  %v720_v51 = vmax.f32 %v683_v42, 0.0  ;;  %v1461_v56 = vld [vmem:[%s1963_s6] sm:$0xff]  }
 0x17d   : > { %v686_v57 = vpop.f32.mrf.mxu0 }
 0x17e   : > { %v687_v36 = vadd.f32 %v686_v57, %v581_v32  ;;  %v721_v52 = vmax.f32 %v685_v44, 0.0 }
 0x17f   : > { %v690_v58 = vpop.f32.mrf.mxu0 }
 0x180   : > { %v691_v40 = vadd.f32 %v690_v58, %v586_v20  ;;  %v722_v47 = vmax.f32 %v687_v36, 0.0  ;;  %v719_v58 = vmax.f32 %v681_v49, 0.0 }
 0x181   : > { %v692_v59 = vpop.f32.mrf.mxu0 }
 0x182   : > { %v693_v29 = vadd.f32 %v692_v59, %v586_v20  ;;  %v723_v50 = vmax.f32 %v691_v40, 0.0  ;;  %v752_v57 = vpack.c.bf16 %v722_v47, %v720_v51  ;;  %v751_v55 = vpack.c.bf16 %v721_v52, %v719_v58  ;;  %v1463_v59 = vld [vmem:[%s1963_s6 + $0x8] sm:$0xff]  }
 0x183   : > { %v694_v60 = vpop.f32.mrf.mxu0 }
 0x184   : > { %v695_v33 = vadd.f32 %v694_v60, %v591_v14  ;;  %v724_v43 = vmax.f32 %v693_v29, 0.0  ;;  %v1464_v60 = vld [vmem:[%s1963_s6 + $0x18] sm:$0xff]  }
 0x185   : > { %v696_v61 = vpop.f32.mrf.mxu0 }
 0x186   : > { %v697_v23 = vadd.f32 %v696_v61, %v591_v14  ;;  %v725_v45 = vmax.f32 %v695_v33, 0.0  ;;  %v1465_v61 = vld [vmem:[%s1963_s6 + $0x20] sm:$0xff]  }
 0x187   : > { %v700_v62 = vpop.f32.mrf.mxu0 }
 0x188   : > { %v701_v27 = vadd.f32 %v700_v62, %v596_v7  ;;  %v726_v37 = vmax.f32 %v697_v23, 0.0  ;;  %v753_v53 = vpack.c.bf16 %v725_v45, %v723_v50  ;;  %v1466_v62 = vld [vmem:[%s1963_s6 + $0x28] sm:$0xff]  }
 0x189   : > { %v702_v0 = vpop.f32.mrf.mxu0 }
 0x18a   : > { %v703_v18 = vadd.f32 %v702_v0, %v596_v7  ;;  %v727_v41 = vmax.f32 %v701_v27, 0.0  ;;  %v754_v48 = vpack.c.bf16 %v726_v37, %v724_v43  ;;  %v1468_v0 = vld [vmem:[%s1963_s6 + $0x38] sm:$0xff]  }
 0x18b   : > { %v704_v2 = vpop.f32.mrf.mxu0 }
 0x18c   : > { %v705_v21 = vadd.f32 %v704_v2, %v601_v5  ;;  %v728_v30 = vmax.f32 %v703_v18, 0.0 }
 0x18d   : > { %v706_v3 = vpop.f32.mrf.mxu0 }
 0x18e   : > { %v707_v11 = vadd.f32 %v706_v3, %v601_v5  ;;  %v729_v34 = vmax.f32 %v705_v21, 0.0  ;;  %v783_v3 = vpop.permute.xlu1 %782 }
 0x18f   : > { %v710_v6 = vpop.f32.mrf.mxu0 }
 0x190   : > { %v711_v15 = vadd.f32 %v710_v6, %v606_v1  ;;  %v730_v24 = vmax.f32 %v707_v11, 0.0  ;;  %v755_v46 = vpack.c.bf16 %v729_v34, %v727_v41 }
 0x191   : > { %v712_v9 = vpop.f32.mrf.mxu0 }
 0x192   : > { %v713_v12 = vadd.f32 %v712_v9, %v606_v1  ;;  %v731_v28 = vmax.f32 %v711_v15, 0.0  ;;  %v756_v38 = vpack.c.bf16 %v730_v24, %v728_v30  ;;  %v778_v1 = vpop.permute.xlu0 %777  ;;  %v1841_v6 = vpop.permute.xlu1 %792 }
 0x193   : > { %v714_v10 = vpop.f32.mrf.mxu0 }
 0x194   : > { %v715_v13 = vadd.f32 %v714_v10, %v611_v63  ;;  %v732_v25 = vmax.f32 %v713_v12, 0.0 }
 0x195   : > { %v716_v8 = vpop.f32.mrf.mxu0 }
 0x196   : > { %v717_v19 = vadd.f32 %v716_v8, %v611_v63  ;;  %v733_v22 = vmax.f32 %v715_v13, 0.0  ;;  %v1467_v63 = vld [vmem:[%s1963_s6 + $0x30] sm:$0xff]   ;;  %v788_v2 = vpop.permute.xlu0 %787  ;;  %v803_v20 = vpop.permute.xlu1 %802 }
 0x198   : > { %v734_v26 = vmax.f32 %v717_v19, 0.0  ;;  %v757_v35 = vpack.c.bf16 %v733_v22, %v731_v28 }
 0x19a   : > { %v758_v31 = vpack.c.bf16 %v734_v26, %v732_v25  ;;  %v798_v5 = vpop.permute.xlu0 %797 }
 0x19c   : > { %928 = vmatprep.subr.bf16.mxu0 %v758_v31  ;;  %1384 = vmatprep.subr.bf16.mxu1 %v758_v31 }
 0x19d   : > { %929 = vmatpush1.bf16.msra.mxu0 %v757_v35  ;;  %1388 = vmatpush1.bf16.msra.mxu1 %v757_v35 }
 0x19e   : > { %930 = vmatprep.subr.bf16.mxu0 %v756_v38  ;;  %1385 = vmatprep.subr.bf16.mxu1 %v756_v38  ;;  %v808_v37 = vpop.permute.xlu0 %807 }
 0x1a1   : > { %931 = vmatpush1.bf16.msra.mxu0 %v755_v46  ;;  %1389 = vmatpush1.bf16.msra.mxu1 %v755_v46 }
 0x1a2   : > { %932 = vmatprep.subr.bf16.mxu0 %v754_v48  ;;  %1386 = vmatprep.subr.bf16.mxu1 %v754_v48  ;;  %v813_v48 = vpop.permute.xlu1 %812 }
 0x1a5   : > { %933 = vmatpush1.bf16.msra.mxu0 %v753_v53  ;;  %1390 = vmatpush1.bf16.msra.mxu1 %v753_v53 }
 0x1a6   : > { %934 = vmatprep.subr.bf16.mxu0 %v752_v57  ;;  %1387 = vmatprep.subr.bf16.mxu1 %v752_v57 }
 0x1a9   : > { %935 = vmatpush1.bf16.msra.mxu0 %v751_v55  ;;  %1391 = vmatpush1.bf16.msra.mxu1 %v751_v55 }
 0x1ac   : > { %1369 = vmatmul.mubr.msk.bf16.vlgmr.msra.gmra.mxu0 %vm895_vm1, %v1461_v56  ;;  %1371 = vmatmul.mubr.msk.bf16.vlgmr.msra.gmra.mxu1 %vm895_vm1, %v1462_v54 }
 0x1ad   : > { %962 = vmatprep.mubr.bf16.mxu0 %v1548_v4  ;;  %982 = vmatprep.mubr.bf16.mxu1 %v1548_v4 }
 0x1b4   : > { %1370 = vmatmul.mubr.msk.bf16.gmra.mxu0 %vm895_vm1, %v1463_v59  ;;  %1372 = vmatmul.mubr.msk.bf16.gmra.mxu1 %vm895_vm1, %v1464_v60 }
 0x1b5   : > { %992 = vmatprep.mubr.bf16.mxu1 %v1548_v4 }
 0x1bc   : > { %1373 = vmatmul.mubr.msk.bf16.gmra.mxu1 %vm895_vm1, %v1465_v61 }
 0x1bd   : > { %1002 = vmatprep.mubr.bf16.mxu1 %v1548_v4 }
 0x1c4   : > { %1374 = vmatmul.mubr.msk.bf16.gmra.mxu1 %vm895_vm1, %v1466_v62 }
 0x1c5   : > { %1012 = vmatprep.mubr.bf16.mxu1 %v1548_v4 }
 0x1cc   : > { %1375 = vmatmul.mubr.msk.bf16.gmra.mxu1 %vm895_vm1, %v1467_v63 }
 0x1cd   : > { %1022 = vmatprep.mubr.bf16.mxu1 %v1548_v4 }
 0x1d4   : > { %1376 = vmatmul.mubr.msk.bf16.gmra.mxu1 %vm895_vm1, %v1468_v0 }
 0x26c   : > { %v954_v7 = vpop.f32.mrf.mxu0  ;;  %v974_v9 = vpop.f32.mrf.mxu1 }
 0x26d   : > { %v955_v10 = vadd.f32 %v954_v7, %v778_v1  ;;  %v975_v11 = vadd.f32 %v974_v9, %v798_v5 }
 0x26e   : > { %v956_v12 = vpop.f32.mrf.mxu0  ;;  %v976_v13 = vpop.f32.mrf.mxu1 }
 0x26f   : > { %v1033_v4 = vmax.f32 %v955_v10, 0.0  ;;  %v1041_v14 = vmax.f32 %v975_v11, 0.0  ;;  %v957_v15 = vadd.f32 %v956_v12, %v778_v1  ;;  %v977_v8 = vadd.f32 %v976_v13, %v798_v5  ;;  %v818_v12 = vpop.permute.xlu0 %817 }
 0x270   : > { %v958_v18 = vpop.f32.mrf.mxu0  ;;  %v978_v19 = vpop.f32.mrf.mxu1 }
 0x271   : > { %v1034_v21 = vmax.f32 %v957_v15, 0.0  ;;  %v1042_v22 = vmax.f32 %v977_v8, 0.0  ;;  %v1084_v23 = vmul.f32 %v1692_v16, %v1033_v4  ;;  %v1092_v24 = vmul.f32 %v1692_v16, %v1041_v14 }
 0x272   : > { %v959_v25 = vadd.f32 %v958_v18, %v783_v3  ;;  %v979_v26 = vadd.f32 %v978_v19, %v803_v20  ;;  %v960_v27 = vpop.f32.mrf.mxu0  ;;  %v980_v28 = vpop.f32.mrf.mxu1 }
 0x273   : > { %v1085_v29 = vmul.f32 %v1695_v17, %v1034_v21  ;;  %v1093_v30 = vmul.f32 %v1695_v17, %v1042_v22  ;;  %v961_v31 = vadd.f32 %v960_v27, %v783_v3  ;;  %v981_v32 = vadd.f32 %v980_v28, %v803_v20  ;;  %v823_v28 = vpop.permute.xlu1 %822 }
 0x274   : > { %v1035_v33 = vmax.f32 %v959_v25, 0.0  ;;  %v1043_v34 = vmax.f32 %v979_v26, 0.0  ;;  %v964_v35 = vpop.f32.mrf.mxu0  ;;  %v984_v36 = vpop.f32.mrf.mxu1 }
 0x275   : > { %v1116_v38 = vadd.f32 %v1085_v29, %v1084_v23  ;;  %v1120_v39 = vadd.f32 %v1093_v30, %v1092_v24  ;;  %v1036_v40 = vmax.f32 %v961_v31, 0.0  ;;  %v1044_v41 = vmax.f32 %v981_v32, 0.0 }
 0x276   : > { %v1086_v42 = vmul.f32 %v1692_v16, %v1035_v33  ;;  %v1094_v43 = vmul.f32 %v1692_v16, %v1043_v34  ;;  %v965_v44 = vadd.f32 %v964_v35, %v788_v2  ;;  %v985_v45 = vadd.f32 %v984_v36, %v808_v37  ;;  %v966_v46 = vpop.f32.mrf.mxu0  ;;  %v986_v47 = vpop.f32.mrf.mxu1 }
 0x277   : > { %v1199_v49 = vmul.f32 0.00390625, %v1116_v38  ;;  %v1203_v50 = vmul.f32 0.00390625, %v1120_v39  ;;  %v1087_v51 = vmul.f32 %v1695_v17, %v1036_v40  ;;  %v1095_v52 = vmul.f32 %v1695_v17, %v1044_v41 }
 0x278   : > { %v1037_v53 = vmax.f32 %v965_v44, 0.0  ;;  %v1045_v57 = vmax.f32 %v985_v45, 0.0  ;;  %v967_v58 = vadd.f32 %v966_v46, %v788_v2  ;;  %v987_v55 = vadd.f32 %v986_v47, %v808_v37  ;;  %v968_v56 = vpop.f32.mrf.mxu0  ;;  %v988_v54 = vpop.f32.mrf.mxu1 }
 0x279   : > { %1215 = vst [vmem:[%s1857_s11] sm:$0xff] %v1199_v49  ;;  %1219 = vst [vmem:[%s1857_s11 + $0x20] sm:$0xff] %v1203_v50  ;;  %v1117_v59 = vadd.f32 %v1087_v51, %v1086_v42  ;;  %v1121_v60 = vadd.f32 %v1095_v52, %v1094_v43  ;;  %v969_v61 = vadd.f32 %v968_v56, %v1841_v6  ;;  %v828_v42 = vpop.permute.xlu0 %827 }
 0x27a   : > { %v989_v62 = vadd.f32 %v988_v54, %v813_v48  ;;  %v1088_v63 = vmul.f32 %v1692_v16, %v1037_v53  ;;  %v1096_v0 = vmul.f32 %v1692_v16, %v1045_v57  ;;  %v1038_v1 = vmax.f32 %v967_v58, 0.0  ;;  %v970_v3 = vpop.f32.mrf.mxu0  ;;  %v990_v5 = vpop.f32.mrf.mxu1 }
 0x27b   : > { %v1046_v2 = vmax.f32 %v987_v55, 0.0  ;;  %v1200_v7 = vmul.f32 0.00390625, %v1117_v59  ;;  %v1204_v9 = vmul.f32 0.00390625, %v1121_v60  ;;  %v1039_v10 = vmax.f32 %v969_v61, 0.0  ;;  %v833_v58 = vpop.permute.xlu1 %832 }
 0x27c   : > { %v1047_v11 = vmax.f32 %v989_v62, 0.0  ;;  %v1089_v13 = vmul.f32 %v1695_v17, %v1038_v1  ;;  %v971_v14 = vadd.f32 %v970_v3, %v1841_v6  ;;  %v991_v15 = vadd.f32 %v990_v5, %v813_v48  ;;  %v994_v8 = vpop.f32.mrf.mxu1 }
 0x27d   : > { %v1097_v4 = vmul.f32 %v1695_v17, %v1046_v2  ;;  %1216 = vst [vmem:[%s1857_s11 + $0x8] sm:$0xff] %v1200_v7  ;;  %1220 = vst [vmem:[%s1857_s11 + $0x28] sm:$0xff] %v1204_v9  ;;  %v995_v18 = vadd.f32 %v994_v8, %v818_v12  ;;  %v1090_v24 = vmul.f32 %v1692_v16, %v1039_v10  ;;  %v838_v2 = vpop.permute.xlu0 %837 }
 0x27e   : > { %v1118_v19 = vadd.f32 %v1089_v13, %v1088_v63  ;;  %v1040_v21 = vmax.f32 %v971_v14, 0.0  ;;  %v1048_v22 = vmax.f32 %v991_v15, 0.0  ;;  %v996_v23 = vpop.f32.mrf.mxu1  ;;  %v1098_v25 = vmul.f32 %v1692_v16, %v1047_v11 }
 0x27f   : > { %v1122_v20 = vadd.f32 %v1097_v4, %v1096_v0  ;;  %v1049_v26 = vmax.f32 %v995_v18, 0.0  ;;  %v997_v27 = vadd.f32 %v996_v23, %v818_v12  ;;  %v843_v15 = vpop.permute.xlu1 %842 }
 0x280   : > { %v1201_v6 = vmul.f32 0.00390625, %v1118_v19  ;;  %v1091_v30 = vmul.f32 %v1695_v17, %v1040_v21  ;;  %v1099_v31 = vmul.f32 %v1695_v17, %v1048_v22  ;;  %v998_v32 = vpop.f32.mrf.mxu1 }
 0x281   : > { %v1205_v29 = vmul.f32 0.00390625, %v1122_v20  ;;  %v1050_v33 = vmax.f32 %v997_v27, 0.0  ;;  %v999_v34 = vadd.f32 %v998_v32, %v823_v28  ;;  %v1100_v38 = vmul.f32 %v1692_v16, %v1049_v26  ;;  %v848_v27 = vpop.permute.xlu0 %847 }
 0x282   : > { %1217 = vst [vmem:[%s1857_s11 + $0x10] sm:$0xff] %v1201_v6  ;;  %v1119_v35 = vadd.f32 %v1091_v30, %v1090_v24  ;;  %v1123_v36 = vadd.f32 %v1099_v31, %v1098_v25  ;;  %v1000_v37 = vpop.f32.mrf.mxu1 }
 0x283   : > { %1221 = vst [vmem:[%s1857_s11 + $0x30] sm:$0xff] %v1205_v29  ;;  %v1101_v39 = vmul.f32 %v1695_v17, %v1050_v33  ;;  %v1051_v40 = vmax.f32 %v999_v34, 0.0  ;;  %v1001_v41 = vadd.f32 %v1000_v37, %v823_v28  ;;  %v853_v37 = vpop.permute.xlu1 %852 }
 0x284   : > { %v1202_v43 = vmul.f32 0.00390625, %v1119_v35  ;;  %v1206_v44 = vmul.f32 0.00390625, %v1123_v36  ;;  %v1004_v45 = vpop.f32.mrf.mxu1 }
 0x285   : > { %v1124_v46 = vadd.f32 %v1101_v39, %v1100_v38  ;;  %v1052_v47 = vmax.f32 %v1001_v41, 0.0  ;;  %v1005_v48 = vadd.f32 %v1004_v45, %v828_v42  ;;  %v1102_v49 = vmul.f32 %v1692_v16, %v1051_v40 }
 0x286   : > { %1218 = vst [vmem:[%s1857_s11 + $0x18] sm:$0xff] %v1202_v43  ;;  %1222 = vst [vmem:[%s1857_s11 + $0x38] sm:$0xff] %v1206_v44  ;;  %v1006_v50 = vpop.f32.mrf.mxu1 }
 0x287   : > { %v1207_v51 = vmul.f32 0.00390625, %v1124_v46  ;;  %v1103_v52 = vmul.f32 %v1695_v17, %v1052_v47  ;;  %v1053_v53 = vmax.f32 %v1005_v48, 0.0  ;;  %v1007_v57 = vadd.f32 %v1006_v50, %v828_v42 }
 0x288   : > { %v1008_v55 = vpop.f32.mrf.mxu1 }
 0x289   : > { %1223 = vst [vmem:[%s1857_s11 + $0x40] sm:$0xff] %v1207_v51  ;;  %v1125_v56 = vadd.f32 %v1103_v52, %v1102_v49  ;;  %v1054_v54 = vmax.f32 %v1007_v57, 0.0  ;;  %v1009_v59 = vadd.f32 %v1008_v55, %v833_v58  ;;  %v1104_v60 = vmul.f32 %v1692_v16, %v1053_v53 }
 0x28a   : > { %v1010_v61 = vpop.f32.mrf.mxu1 }
 0x28b   : > { %v1208_v62 = vmul.f32 0.00390625, %v1125_v56  ;;  %v1105_v63 = vmul.f32 %v1695_v17, %v1054_v54  ;;  %v1055_v0 = vmax.f32 %v1009_v59, 0.0  ;;  %v1011_v1 = vadd.f32 %v1010_v61, %v833_v58 }
 0x28c   : > { %v1014_v3 = vpop.f32.mrf.mxu1 }
 0x28d   : > { %1224 = vst [vmem:[%s1857_s11 + $0x48] sm:$0xff] %v1208_v62  ;;  %v1126_v5 = vadd.f32 %v1105_v63, %v1104_v60  ;;  %v1056_v7 = vmax.f32 %v1011_v1, 0.0  ;;  %v1015_v9 = vadd.f32 %v1014_v3, %v838_v2  ;;  %v1106_v10 = vmul.f32 %v1692_v16, %v1055_v0 }
 0x28e   : > { %v1016_v11 = vpop.f32.mrf.mxu1 }
 0x28f   : > { %v1209_v12 = vmul.f32 0.00390625, %v1126_v5  ;;  %v1107_v13 = vmul.f32 %v1695_v17, %v1056_v7  ;;  %v1057_v4 = vmax.f32 %v1015_v9, 0.0  ;;  %v1017_v14 = vadd.f32 %v1016_v11, %v838_v2 }
 0x290   : > { %v1018_v8 = vpop.f32.mrf.mxu1 }
 0x291   : > { %1225 = vst [vmem:[%s1857_s11 + $0x50] sm:$0xff] %v1209_v12  ;;  %v1127_v18 = vadd.f32 %v1107_v13, %v1106_v10  ;;  %v1058_v19 = vmax.f32 %v1017_v14, 0.0  ;;  %v1019_v20 = vadd.f32 %v1018_v8, %v843_v15  ;;  %v1108_v21 = vmul.f32 %v1692_v16, %v1057_v4 }
 0x292   : > { %v1020_v22 = vpop.f32.mrf.mxu1 }
 0x293   : > { %v1210_v23 = vmul.f32 0.00390625, %v1127_v18  ;;  %v1109_v24 = vmul.f32 %v1695_v17, %v1058_v19  ;;  %v1059_v25 = vmax.f32 %v1019_v20, 0.0  ;;  %v1021_v26 = vadd.f32 %v1020_v22, %v843_v15 }
 0x294   : > { %v1024_v28 = vpop.f32.mrf.mxu1 }
 0x295   : > { %1226 = vst [vmem:[%s1857_s11 + $0x58] sm:$0xff] %v1210_v23  ;;  %v1128_v6 = vadd.f32 %v1109_v24, %v1108_v21  ;;  %v1060_v29 = vmax.f32 %v1021_v26, 0.0  ;;  %v1025_v30 = vadd.f32 %v1024_v28, %v848_v27  ;;  %v1110_v31 = vmul.f32 %v1692_v16, %v1059_v25 }
 0x296   : > { %v1026_v32 = vpop.f32.mrf.mxu1 }
 0x297   : > { %v1211_v33 = vmul.f32 0.00390625, %v1128_v6  ;;  %v1111_v34 = vmul.f32 %v1695_v17, %v1060_v29  ;;  %v1061_v35 = vmax.f32 %v1025_v30, 0.0  ;;  %v1027_v36 = vadd.f32 %v1026_v32, %v848_v27 }
 0x298   : > { %v1028_v38 = vpop.f32.mrf.mxu1 }
 0x299   : > { %1227 = vst [vmem:[%s1857_s11 + $0x60] sm:$0xff] %v1211_v33  ;;  %v1129_v39 = vadd.f32 %v1111_v34, %v1110_v31  ;;  %v1062_v40 = vmax.f32 %v1027_v36, 0.0  ;;  %v1029_v41 = vadd.f32 %v1028_v38, %v853_v37  ;;  %v1112_v42 = vmul.f32 %v1692_v16, %v1061_v35 }
 0x29a   : > { %v1030_v43 = vpop.f32.mrf.mxu1 }
 0x29b   : > { %v1212_v44 = vmul.f32 0.00390625, %v1129_v39  ;;  %v1113_v45 = vmul.f32 %v1695_v17, %v1062_v40  ;;  %v1063_v46 = vmax.f32 %v1029_v41, 0.0  ;;  %v1031_v47 = vadd.f32 %v1030_v43, %v853_v37 }
 0x29d   : > { %1228 = vst [vmem:[%s1857_s11 + $0x68] sm:$0xff] %v1212_v44  ;;  %v1130_v48 = vadd.f32 %v1113_v45, %v1112_v42  ;;  %v1064_v49 = vmax.f32 %v1031_v47, 0.0  ;;  %v1114_v51 = vmul.f32 %v1692_v16, %v1063_v46 }
 0x29f   : > { %v1213_v50 = vmul.f32 0.00390625, %v1130_v48  ;;  %v1115_v52 = vmul.f32 %v1695_v17, %v1064_v49 }
 0x2a1   : > { %1229 = vst [vmem:[%s1857_s11 + $0x70] sm:$0xff] %v1213_v50  ;;  %v1131_v53 = vadd.f32 %v1115_v52, %v1114_v51 }
 0x2a3   : > { %v1214_v57 = vmul.f32 0.00390625, %v1131_v53 }
 0x2a5   : > { %1230 = vst [vmem:[%s1857_s11 + $0x78] sm:$0xff] %v1214_v57 }
 0x2a6   : > { %1482 = shalt.err (!%p1479_p5)
}
 0x2a7   : > { %s1483_s25 = scalar_lea.hbm %s1905_s20, 2048  ;;  %s1487_s12 = scalar_lea.hbm %s1965_s8, 4096 }
 0x2a8   : > { %p1484_p6 = scmp.ne.s32.totalorder %s1905_s20, %s1483_s25  ;;  %p1488_p10 = scmp.lt.s32.totalorder %s1905_s20, %s1965_s8 }
 0x2a9   : > { %p1489_p11 = scmp.lt.s32.totalorder %s1487_s12, %s1483_s25 }
 0x2aa   : > { %p1485_p7 = pnand %p1484_p6, %p1637_p4 }
 0x2ab   : > { %p1490_p12 = por %p1489_p11, %p1488_p10 }
 0x2ac   : > { %p1486_p9 = pneg %p1485_p7 }
 0x2ae   : > { %p1491_p13 = pnand %p1490_p12, %p1486_p9 }
 0x2b0   : > { %1494 = shalt.err (!%p1491_p13)
}
 0x2b1   : > { %s1550_s22 = smov 128   ;;  %s1551_s30 = smov 8  }
 0x2b2   : > { %1392 = dma.vmem_to_hbm [thread:$0]  (%p1637_p4), %s1907_s14, 2048, %s1905_s20, %s1912_s21, %s1550_s22, %s1550_s22, %s1551_s30  }
 0x2b3 PF: > { %p1398_p0 = scmp.ge.s32.totalorder %s1545_s10, 2  ;;  %s1262_s23 = sand.u32 1, %s1525_s27  }
 0x2b4   : > { %s1263_s24 = scalar_lea.sflag [#allocation4], %s1262_s23 }
 0x2b5   : > { %p1395_p1 = pnand %p1398_p0, %p1644_p8 }
 0x2b7   : > { %p1396_p2 = pneg %p1395_p1 }
 0x2b9   : > { %1520 = dma.done.wait (%p1396_p2), %s1263_s24, 2048  }
 0x2ba   : > { %1522 = vsyncadd (%p1396_p2), %s1263_s24, 4294965248  ;;  %s21_s10 = sadd.s32 1, %s1545_s10   ;;  %s1968_s27 = smov %s1529_s28 }
 0x2bb   : > { %p18_p3 = scmp.ge.s32.totalorder %s21_s10, 4   ;;  %s1969_s28 = smov %s1533_s29 }
 0x2bc   : > { %s1970_s29 = smov %s1650_s18  ;;  %s1971_s30 = smov %s1541_s9 }
 0x2bd   : > { %s1972_s9 = smov %s1974_s13  ;;  %20 = sbr.rel (!%p18_p3) target bundleno = 4 (0x4), region = 98 }
 0x2c2   :  { %1268 = vsyncpa [#allocation4], 1 }
 0x2c3   :  { %1270 = vsyncpa [#allocation4 + $0x1], 1 }

</bundles_post_ra>
